<compile_context>
chip_gen: v5e
topology: v5e:2x2
jax: 0.10.0
libtpu: 0.0.40
codegen_flags: <defaults>
</compile_context>

<pallas_src>
import jax
import jax.numpy as jnp
from jax.experimental import pallas as pl
from jax.experimental.pallas import tpu as pltpu


def _round_up(x: int, m: int) -> int:
    return ((x + m - 1) // m) * m


def _choose_tb(B: int, Sp: int, Fp: int) -> int:
    """Pick batch-block size TB (divisor of B): target ~256 MXU rows per step,
    cap the per-block feature bytes, keep >=2 grid steps when possible."""
    budget_bytes = 2 * 1024 * 1024      # per-buffer feature block budget
    target_rows = 256                   # aim M = TB*Sp near MXU-friendly size
    best = 1
    for d in range(1, B + 1):
        if B % d != 0:
            continue
        if d * Sp * Fp * 4 > budget_bytes:
            continue
        if d * Sp > target_rows and best * Sp >= target_rows:
            continue
        best = d
    if B // best < 2:                   # keep the grid shardable across 2 TCs
        for d in range(best - 1, 0, -1):
            if B % d == 0:
                best = d
                break
    return best


def attention_head_kernel(feat_ref, mask_ref, w_ref, b_ref, vw_ref, vb_ref, out_ref):
    TB, S, F = feat_ref.shape            # padded sizes: S % 8 == 0, F % 128 == 0
    H = w_ref.shape[1]                   # padded: H % 128 == 0

    feat = feat_ref[...]                 # (TB, S, F)
    mask = mask_ref[...][:, 0, :]        # (TB, S) float (1 = keep, 0 = pad)

    # att = tanh(features @ W + b)  — one big lane-dense MXU matmul per step.
    feat2d = feat.reshape(TB * S, F)     # tile-aligned merge (S % 8 == 0)
    att = jnp.tanh(
        jnp.dot(feat2d, w_ref[...], preferred_element_type=jnp.float32)
        + b_ref[...]
    )                                    # (TB*S, H), f32

    # score = att @ V + v_b  -> kept lane-dense as (TB, S).
    score = jnp.sum(att.reshape(TB, S, H) * vw_ref[...], axis=-1)   # (TB, S)
    score = score + vb_ref[0]            # scalar bias from SMEM

    # score[attention_mask == 0] = -10000.0   (padded positions have mask == 0)
    score = jnp.where(mask == 0.0, jnp.float32(-10000.0), score)

    # softmax over the sequence axis (torch dim=1) — lane-axis reductions.
    m = jnp.max(score, axis=-1, keepdims=True)          # (TB, 1)
    e = jnp.exp(score - m)                              # (TB, S)
    denom = jnp.sum(e, axis=-1, keepdims=True)          # (TB, 1)
    attn = e * pl.reciprocal(denom, approx=True)        # (TB, S)

    # context_vector = sum_s attn * mask * features  — batched MXU contraction.
    wattn = attn * mask                                 # (TB, S)
    ctx = jnp.einsum("bqs,bsf->bqf", wattn[:, None, :], feat,
                     preferred_element_type=jnp.float32)   # (TB, 1, F)
    out_ref[...] = ctx.astype(out_ref.dtype)


def attention_head(features, attention_mask, w, b, vw, vb):
    """features: (B, S, F); attention_mask: (B, S); returns (B, F)."""
    B, S, F = features.shape
    H = w.shape[1]

    # Pad to TPU-friendly sizes (zero padding is exact: padded tokens get
    # mask 0, padded hidden/feature columns contribute nothing).
    Sp = _round_up(S, 8)
    Fp = _round_up(F, 128)
    Hp = _round_up(H, 128)

    f32 = jnp.float32
    feat_p = jnp.zeros((B, Sp, Fp), f32).at[:, :S, :F].set(features.astype(f32))
    mask_p = jnp.zeros((B, 1, Sp), f32).at[:, 0, :S].set(attention_mask.astype(f32))
    w_p = jnp.zeros((Fp, Hp), f32).at[:F, :H].set(w.astype(f32))
    b_p = jnp.zeros((1, Hp), f32).at[0, :H].set(b.astype(f32))
    vw_p = jnp.zeros((1, Hp), f32).at[0, :H].set(vw.astype(f32))
    vb_p = jnp.asarray(vb, f32).reshape(1)

    TB = _choose_tb(B, Sp, Fp)
    grid = (B // TB,)

    out = pl.pallas_call(
        attention_head_kernel,
        out_shape=jax.ShapeDtypeStruct((B, 1, Fp), features.dtype),
        grid_spec=pltpu.PrefetchScalarGridSpec(
            num_scalar_prefetch=0,
            grid=grid,
            in_specs=[
                pl.BlockSpec((TB, Sp, Fp), lambda i: (i, 0, 0)),   # features
                pl.BlockSpec((TB, 1, Sp), lambda i: (i, 0, 0)),    # mask
                pl.BlockSpec((Fp, Hp), lambda i: (0, 0)),          # W (resident)
                pl.BlockSpec((1, Hp), lambda i: (0, 0)),           # W bias
                pl.BlockSpec((1, Hp), lambda i: (0, 0)),           # V weight
                pl.BlockSpec(memory_space=pltpu.MemorySpace.SMEM), # V bias (scalar)
            ],
            out_specs=pl.BlockSpec((TB, 1, Fp), lambda i: (i, 0, 0)),
        ),
        compiler_params=pltpu.CompilerParams(
            dimension_semantics=("parallel",),
            vmem_limit_bytes=32 * 1024 * 1024,
        ),
    )(feat_p, mask_p, w_p, b_p, vw_p, vb_p)

    return out.reshape(B, Fp)[:, :F]


if __name__ == "__main__":
    B, S, F, H = 4, 8, 32, 16     # batch, seq, in_features, hidden_dim
    key = jax.random.PRNGKey(0)
    k1, k2, k3, k4, k5 = jax.random.split(key, 5)

    features = jax.random.normal(k1, (B, S, F), dtype=jnp.float32)
    # attention mask: 1 = real token, 0 = padding (varied valid lengths)
    attention_mask = jnp.array(
        [[1.0] * S,
         [1.0] * 5 + [0.0] * (S - 5),
         [1.0] * 3 + [0.0] * (S - 3),
         [1.0] * S],
        dtype=jnp.float32,
    )

    # Deterministic "Linear" parameter init (synthetic, not a checkpoint load).
    w = jax.random.normal(k2, (F, H), dtype=jnp.float32) * 0.1
    b = jax.random.normal(k3, (H,), dtype=jnp.float32) * 0.1
    vw = jax.random.normal(k4, (H,), dtype=jnp.float32) * 0.1
    vb = jax.random.normal(k5, (1,), dtype=jnp.float32) * 0.1

    out = attention_head(features, attention_mask, w, b, vw, vb)
    out = jax.block_until_ready(out)

    # pure-JAX reference for correctness
    att = jnp.tanh(features @ w + b)
    score = att @ vw.reshape(H, 1) + vb
    score = jnp.where(attention_mask[..., None] == 0, -10000.0, score)
    attn = jax.nn.softmax(score, axis=1)
    ref = jnp.sum(attn * attention_mask[..., None] * features, axis=1)

    assert out.shape == ref.shape, f"shape mismatch {out.shape} vs {ref.shape}"
    # tolerance loosened slightly because of the approximate (EUP) reciprocal
    assert jnp.allclose(out, ref, atol=1e-2, rtol=1e-2), "mismatch vs reference"

    print("KERNEL_OK")
</pallas_src>

<mosaic_0001>
module attributes {stable_mosaic.version = 11 : i64} {
  func.func @attention_head_kernel(%arg0: i32, %arg1: memref<2x8x128xf32, #tpu.memory_space<vmem>>, %arg2: memref<2x1x8xf32, #tpu.memory_space<vmem>>, %arg3: memref<128x128xf32, #tpu.memory_space<vmem>>, %arg4: memref<1x128xf32, #tpu.memory_space<vmem>>, %arg5: memref<1x128xf32, #tpu.memory_space<vmem>>, %arg6: memref<1xf32, #tpu.memory_space<smem>>, %arg7: memref<2x1x128xf32, #tpu.memory_space<vmem>>) attributes {dimension_semantics = [#tpu.dimension_semantics<parallel>], iteration_bounds = array<i64: 2>, scalar_prefetch = 0 : i64, scratch_operands = 0 : i64, tpu.core_type = #tpu.core_type<tc>, window_params = [{transform_indices = @transform_0, window_bounds = array<i64: 2, 8, 128>}, {transform_indices = @transform_1, window_bounds = array<i64: 2, 1, 8>}, {pipeline_mode = #tpu.pipeline_mode<synchronous>, transform_indices = @transform_2, window_bounds = array<i64: 128, 128>}, {pipeline_mode = #tpu.pipeline_mode<synchronous>, transform_indices = @transform_3, window_bounds = array<i64: 1, 128>}, {pipeline_mode = #tpu.pipeline_mode<synchronous>, transform_indices = @transform_4, window_bounds = array<i64: 1, 128>}, {transform_indices = @transform_5, window_bounds = array<i64: 1>}, {transform_indices = @transform_6, window_bounds = array<i64: 2, 1, 128>}]} {
    %c0 = arith.constant 0 : index
    %c0_0 = arith.constant 0 : index
    %c0_1 = arith.constant 0 : index
    %0 = vector.load %arg1[%c0, %c0_0, %c0_1] : memref<2x8x128xf32, #tpu.memory_space<vmem>>, vector<2x8x128xf32>
    %c0_2 = arith.constant 0 : index
    %c0_3 = arith.constant 0 : index
    %c0_4 = arith.constant 0 : index
    %1 = vector.load %arg2[%c0_2, %c0_3, %c0_4] : memref<2x1x8xf32, #tpu.memory_space<vmem>>, vector<2x1x8xf32>
    %2 = vector.shape_cast %1 : vector<2x1x8xf32> to vector<2x8xf32>
    %3 = vector.shape_cast %0 : vector<2x8x128xf32> to vector<16x128xf32>
    %c0_5 = arith.constant 0 : index
    %c0_6 = arith.constant 0 : index
    %4 = vector.load %arg3[%c0_5, %c0_6] : memref<128x128xf32, #tpu.memory_space<vmem>>, vector<128x128xf32>
    %cst = arith.constant dense<0.000000e+00> : vector<16x128xf32>
    %5 = tpu.matmul %3, %4, %cst {dimension_numbers = #tpu.dot_dimension_numbers<[1], [0], [0], [1], [0, 0, 1, 1], [], []>} : vector<16x128xf32>, vector<128x128xf32>, vector<16x128xf32> -> vector<16x128xf32>
    %c0_7 = arith.constant 0 : index
    %c0_8 = arith.constant 0 : index
    %6 = vector.load %arg4[%c0_7, %c0_8] : memref<1x128xf32, #tpu.memory_space<vmem>>, vector<1x128xf32>
    %7 = vector.broadcast %6 : vector<1x128xf32> to vector<16x128xf32>
    %8 = arith.addf %5, %7 : vector<16x128xf32>
    %9 = math.tanh %8 : vector<16x128xf32>
    %10 = vector.shape_cast %9 : vector<16x128xf32> to vector<2x8x128xf32>
    %c0_9 = arith.constant 0 : index
    %c0_10 = arith.constant 0 : index
    %11 = vector.load %arg5[%c0_9, %c0_10] : memref<1x128xf32, #tpu.memory_space<vmem>>, vector<1x128xf32>
    %12 = vector.shape_cast %11 : vector<1x128xf32> to vector<1x1x128xf32>
    %13 = vector.broadcast %12 : vector<1x1x128xf32> to vector<2x8x128xf32>
    %14 = arith.mulf %10, %13 : vector<2x8x128xf32>
    %cst_11 = arith.constant dense<0.000000e+00> : vector<2x8xf32>
    %15 = vector.multi_reduction <add>, %14, %cst_11 [2] : vector<2x8x128xf32> to vector<2x8xf32>
    %c0_12 = arith.constant 0 : index
    %16 = memref.load %arg6[%c0_12] : memref<1xf32, #tpu.memory_space<smem>>
    %17 = vector.broadcast %16 : f32 to vector<2x8xf32>
    %18 = arith.addf %15, %17 : vector<2x8xf32>
    %cst_13 = arith.constant 0.000000e+00 : f32
    %19 = vector.broadcast %cst_13 : f32 to vector<2x8xf32>
    %20 = arith.cmpf oeq, %2, %19 : vector<2x8xf32>
    %cst_14 = arith.constant -1.000000e+04 : f32
    %21 = vector.broadcast %cst_14 : f32 to vector<2x8xf32>
    %22 = arith.select %20, %21, %18 : vector<2x8xi1>, vector<2x8xf32>
    %cst_15 = arith.constant dense<0xFF800000> : vector<2xf32>
    %23 = vector.multi_reduction <maximumf>, %22, %cst_15 [1] : vector<2x8xf32> to vector<2xf32>
    %24 = vector.shape_cast %23 : vector<2xf32> to vector<2x1xf32>
    %25 = vector.broadcast %24 : vector<2x1xf32> to vector<2x8xf32>
    %26 = arith.subf %22, %25 : vector<2x8xf32>
    %27 = math.exp %26 : vector<2x8xf32>
    %cst_16 = arith.constant dense<0.000000e+00> : vector<2xf32>
    %28 = vector.multi_reduction <add>, %27, %cst_16 [1] : vector<2x8xf32> to vector<2xf32>
    %29 = vector.shape_cast %28 : vector<2xf32> to vector<2x1xf32>
    %30 = tpu.reciprocal %29 {approx = true} : vector<2x1xf32> -> vector<2x1xf32>
    %31 = vector.broadcast %30 : vector<2x1xf32> to vector<2x8xf32>
    %32 = arith.mulf %27, %31 : vector<2x8xf32>
    %33 = arith.mulf %32, %2 : vector<2x8xf32>
    %34 = vector.shape_cast %33 : vector<2x8xf32> to vector<2x1x8xf32>
    "tpu.trace_start"() <{level = 10 : i32, message = "bqs,bsf->bqf"}> : () -> ()
    %cst_17 = arith.constant dense<0.000000e+00> : vector<2x1x128xf32>
    %35 = tpu.matmul %34, %0, %cst_17 {dimension_numbers = #tpu.dot_dimension_numbers<[2], [1], [1], [2], [0, 0, 0, 1, 1, 2], [0], [0]>} : vector<2x1x8xf32>, vector<2x8x128xf32>, vector<2x1x128xf32> -> vector<2x1x128xf32>
    "tpu.trace_stop"() : () -> ()
    %c0_18 = arith.constant 0 : index
    %c0_19 = arith.constant 0 : index
    %c0_20 = arith.constant 0 : index
    %36 = vector.load %arg7[%c0_18, %c0_19, %c0_20] : memref<2x1x128xf32, #tpu.memory_space<vmem>>, vector<2x1x128xf32>
    tpu.vector_store %arg7[%c0_18, %c0_19, %c0_20], %35 {strides = array<i32>} : memref<2x1x128xf32, #tpu.memory_space<vmem>>, vector<2x1x128xf32>,
    return
  }
  func.func @transform_0(%arg0: i32) -> (i32, i32, i32) {
    %c0_i32 = arith.constant 0 : i32
    %c0_i32_0 = arith.constant 0 : i32
    %c0_i32_1 = arith.constant 0 : i32
    return %arg0, %c0_i32, %c0_i32_0 : i32, i32, i32
  }
  func.func @transform_1(%arg0: i32) -> (i32, i32, i32) {
    %c0_i32 = arith.constant 0 : i32
    %c0_i32_0 = arith.constant 0 : i32
    %c0_i32_1 = arith.constant 0 : i32
    return %arg0, %c0_i32, %c0_i32_0 : i32, i32, i32
  }
  func.func @transform_2(%arg0: i32) -> (i32, i32) {
    %c0_i32 = arith.constant 0 : i32
    %c0_i32_0 = arith.constant 0 : i32
    %c0_i32_1 = arith.constant 0 : i32
    return %c0_i32, %c0_i32_0 : i32, i32
  }
  func.func @transform_3(%arg0: i32) -> (i32, i32) {
    %c0_i32 = arith.constant 0 : i32
    %c0_i32_0 = arith.constant 0 : i32
    %c0_i32_1 = arith.constant 0 : i32
    return %c0_i32, %c0_i32_0 : i32, i32
  }
  func.func @transform_4(%arg0: i32) -> (i32, i32) {
    %c0_i32 = arith.constant 0 : i32
    %c0_i32_0 = arith.constant 0 : i32
    %c0_i32_1 = arith.constant 0 : i32
    return %c0_i32, %c0_i32_0 : i32, i32
  }
  func.func @transform_5(%arg0: i32) -> i32 {
    %c0_i32 = arith.constant 0 : i32
    %c0_i32_0 = arith.constant 0 : i32
    return %c0_i32 : i32
  }
  func.func @transform_6(%arg0: i32) -> (i32, i32, i32) {
    %c0_i32 = arith.constant 0 : i32
    %c0_i32_0 = arith.constant 0 : i32
    %c0_i32_1 = arith.constant 0 : i32
    return %arg0, %c0_i32, %c0_i32_0 : i32, i32, i32
  }
}

</mosaic_0001>

<bundles_post_ra>
// kernel: tpu_custom_call.1
= control target key start
LH: loop header
LB: loop body
LE: loop exit
PB: predicated region body
PF: predicated region fallthrough
CT: control target
= control target key end

     0   :  { %s1190_s0 = inlined_call_operand.hbm [shape: f32[4,8,128], index: 0, kind: input, shape index: {}]   ;;  %s1191_s1 = inlined_call_operand.hbm [shape: f32[4,1,8], index: 1, kind: input, shape index: {}]   ;;  %s1192_s2 = inlined_call_operand.hbm [shape: f32[128,128], index: 2, kind: input, shape index: {}]   ;;  %s1193_s3 = inlined_call_operand.vmem [shape: f32[1,128], index: 3, kind: input, shape index: {}]   ;;  %s1194_s4 = inlined_call_operand.vmem [shape: f32[1,128], index: 4, kind: input, shape index: {}]   ;;  %s1195_s5 = inlined_call_operand.<no memory space> [shape: f32[1], index: 5, kind: input, shape index: {}]   ;;  %s1196_s6 = inlined_call_operand.hbm [shape: f32[4,1,128], index: 6, kind: output, shape index: {}]  }
   0x1   :  { %1202 = sst [smem:[#allocation17_spill]] %s1192_s2 }
   0x2   :  { %11 = sst [smem:[#allocation2]] %s1195_s5 }
   0x3   :  { %12 = vsyncpa [#allocation4], 0 }
   0x4   :  { %14 = vsyncpa [#allocation4 + $0x1], 0 }
   0x5   :  { %15 = vsyncpa [#allocation7], 0 }
   0x6   :  { %17 = vsyncpa [#allocation7 + $0x1], 0 }
   0x7   :  { %18 = vsyncpa [#allocation5], 0 }
   0x8   :  { %20 = vsyncpa [#allocation5 + $0x1], 0  ;;  %s998_s23 = smov 0   ;;  %s1000_s24 = smov 0  }
   0x9   :  { %s1002_s25 = smov 0   ;;  %s1004_s26 = smov 0  }
   0xa LB: > { %1203 = sst [smem:[#allocation14_spill]] %s946_s25  ;;  %s1019_s5 = sadd.s32 4294967295, %s950_s26   ;;  %s950_s26 = sphi %s1004_s26, %s1215_s26   ;;  %s946_s25 = sphi %s1002_s25, %s1217_s25   ;;  %s942_s24 = sphi %s1000_s24, %s1219_s24   ;;  %s938_s23 = sphi %s998_s23, %s1218_s23  }
   0xb   : > { %s666_s27 = sadd.s32 4294967294, %s950_s26   ;;  %p46_p0 = scmp.ne.s32.totalorder %s942_s24, %s938_s23 }
   0xc   : > { %p47_p1 = scmp.eq.s32.totalorder %s1019_s5, 0  ;;  %p180_p2 = scmp.eq.s32.totalorder %s1019_s5, 1 }
   0xd   : > { %p186_p3 = scmp.eq.s32.totalorder %s666_s27, 1  ;;  %p667_p5 = scmp.ge.s32.totalorder %s950_s26, 1 }
   0xe   : > { %p1028_p4 = por %p47_p1, %p46_p0  ;;  %p193_p7 = scmp.lt.s32.totalorder %s950_s26, 3 }
   0xf   : > { %p1033_p6 = por %p186_p3, %p46_p0  ;;  %s1206_s2 = sld [smem:[#allocation17_spill]] }
  0x10   : > { %p1041_p8 = pnand %p667_p5, %p193_p7  ;;  %s952_s10 = smov [#allocation8]  }
  0x11   : > { %s206_s11 = sshll.u32 %s952_s10, 4  ;;  %s1051_s12 = sadd.s32 1, %s950_s26   ;;  %s207_s11 = int_to_ptr.vmem [resolvable:$true] %s206_s11 }
  0x12   : > { %p713_p9 = pneg %p1041_p8  ;;  %1208 = sst [smem:[#allocation15_spill]] %s1051_s12 }
  0x13   : > { %s1197_s13 = smov 128   ;;  %s1198_s14 = smov 8  }
  0x14   : > { %p714_p10 = pnand %p713_p9, %p47_p1  ;;  %s30_s15 = ssub.s32 %s950_s26, %s1051_s12 }
  0x15   : > { %s204_s8 = sshll.u32 %s1206_s2, 4  ;;  %s33_s16 = sadd.s32 1, %s946_s25  ;;  %s205_s8 = int_to_ptr.hbm [resolvable:$true] %s204_s8 }
  0x16   : > { %716 = dma.hbm_to_vmem [thread:$0]  (!%p714_p10), %s205_s8, 2048, %s207_s11, [#allocation7], %s1197_s13, %s1197_s13, %s1198_s14  }
  0x17   : > { %p31_p12 = scmp.eq.s32.totalorder %s30_s15, 0  ;;  %p40_p13 = scmp.ne.s32.totalorder %s946_s25, %s942_s24 }
  0x18   : > { %p41_p0 = scmp.eq.s32.totalorder %s950_s26, 0  ;;  %p729_p3 = scmp.lt.s32.totalorder %s950_s26, 2 }
  0x19   : > { %s1064_s17 = scalar_select %p31_p12, %s946_s25, %s33_s16  }
  0x1a   : > { %p42_p5 = por %p41_p0, %p40_p13  ;;  %p1068_p7 = por %p180_p2, %p40_p13 }
  0x1b   : > { %1209 = sst [smem:[#allocation16_spill]] %s1064_s17  ;;  %s1073_s19 = sand.u32 1, %s946_s25  }
  0x1c   : > { %s686_s20 = sshll.u32 %s950_s26, 4  ;;  %s670_s21 = sshll.u32 %s1073_s19, 4 }
  0x1d   : > { %s238_s30 = scalar_lea.hbm %s1190_s0, %s686_s20  ;;  %s233_s8 = scalar_lea.vmem [#allocation3], %s670_s21 }
  0x1e   : > { %s239_s7 = sshll.u32 %s238_s30, 4  ;;  %s241_s10 = sshll.u32 %s233_s8, 4  ;;  %s240_s7 = int_to_ptr.hbm [resolvable:$true] %s239_s7  ;;  %s242_s10 = int_to_ptr.vmem [resolvable:$true] %s241_s10 }
  0x1f   : > { %p1082_p2 = pnand %p729_p3, %p42_p5  ;;  %s251_s15 = sand.u32 1, %s950_s26  }
  0x20   : > { %s673_s16 = sshll.u32 %s1073_s19, 1  ;;  %s230_s13 = scalar_lea.sflag [#allocation4], %s1073_s19 }
  0x21   : > { %s816_s14 = sshra.s32 %s240_s7, 4  ;;  %p820_p10 = pneg %p1082_p2  ;;  %s817_s14 = int_to_ptr.hbm [resolvable:$true] %s816_s14 }
  0x22   : > { %s818_s2 = scalar_lea.hbm %s817_s14, 16  ;;  %s823_s22 = scalar_lea.hbm %s1190_s0, 32 }
  0x23   : > { %p819_p9 = scmp.ne.s32.totalorder %s817_s14, %s818_s2  ;;  %p824_p0 = scmp.lt.s32.totalorder %s817_s14, %s1190_s0 }
  0x24   : > { %p825_p3 = scmp.lt.s32.totalorder %s823_s22, %s818_s2 }
  0x25   : > { %p821_p12 = pnand %p820_p10, %p819_p9 }
  0x26   : > { %p826_p5 = por %p825_p3, %p824_p0 }
  0x27   : > { %p822_p13 = pneg %p821_p12 }
  0x29   : > { %p827_p11 = pnand %p826_p5, %p822_p13 }
  0x2b   : > { %830 = shalt.err (!%p827_p11)
}
  0x2c   : > { %s1212_s19 = smov 8   ;;  %s1213_s8 = smov 128  }
  0x2d   : > { %720 = dma.hbm_to_vmem [thread:$0]  (!%p1082_p2), %s240_s7, 256, %s242_s10, %s230_s13, %s1213_s8, %s1213_s8, %s1212_s19  }
  0x2e   : > { %s674_s17 = sshll.u32 %s950_s26, 1  ;;  %s255_s25 = scalar_lea.vmem [#allocation6], %s673_s16 }
  0x2f   : > { %s262_s20 = sshll.u32 %s255_s25, 4  ;;  %s259_s27 = scalar_lea.hbm %s1191_s1, %s674_s17  ;;  %s263_s20 = int_to_ptr.vmem [resolvable:$true] %s262_s20 }
  0x30   : > { %s260_s2 = sshll.u32 %s259_s27, 4  ;;  %s252_s14 = scalar_lea.sflag [#allocation7], %s251_s15  ;;  %s261_s2 = int_to_ptr.hbm [resolvable:$true] %s260_s2 }
  0x31   : > { %s846_s22 = sshra.s32 %s261_s2, 4  ;;  %s853_s25 = scalar_lea.hbm %s1191_s1, 4  ;;  %s847_s22 = int_to_ptr.hbm [resolvable:$true] %s846_s22 }
  0x32   : > { %s848_s30 = scalar_lea.hbm %s847_s22, 2  ;;  %p854_p13 = scmp.lt.s32.totalorder %s847_s22, %s1191_s1 }
  0x33   : > { %p849_p11 = scmp.ne.s32.totalorder %s847_s22, %s848_s30  ;;  %p855_p0 = scmp.lt.s32.totalorder %s853_s25, %s848_s30 }
  0x35   : > { %p851_p9 = pnand %p849_p11, %p820_p10  ;;  %p856_p3 = por %p855_p0, %p854_p13 }
  0x37   : > { %p852_p12 = pneg %p851_p9 }
  0x39   : > { %p857_p5 = pnand %p856_p3, %p852_p12 }
  0x3b   : > { %860 = shalt.err (!%p857_p5)
}
  0x3c   : > { %s955_s12 = smov 16   ;;  %s956_s17 = smov 1  }
  0x3d   : > { %723 = dma.hbm_to_vmem [thread:$0]  (!%p1082_p2), %s261_s2, 32, %s263_s20, %s252_s14, %s955_s12, %s955_s12, %s956_s17  }
  0x3e   : > { %274 = sbr.rel (%p1041_p8) target bundleno = 923 (0x39b), region = 44  ;;  %s1123_s15 = sand.u32 (!%p1041_p8), 1, %s942_s24  }
  0x3f   : > { %s676_s19 = sshll.u32 (!%p1041_p8), %s1123_s15, 4  ;;  %s277_s8 = scalar_lea.sflag (!%p1041_p8), [#allocation4], %s1123_s15 }
  0x40   : > { %s280_s21 = scalar_lea.vmem (!%p1041_p8), [#allocation3], %s676_s19 }
  0x43   : > { %921 = dma.done.wait (%p1028_p4), %s277_s8, 256  }
  0x44   : > { %923 = vsyncadd (%p1028_p4), %s277_s8, 4294967040  ;;  %s286_s9 = sand.u32 1, %s1019_s5   ;;  %s677_s11 = sshll.u32 %s1123_s15, 1 }
  0x45   : > { %s287_s20 = scalar_lea.sflag [#allocation7], %s286_s9  ;;  %s1135_s27 = scalar_lea.vmem [#allocation6], %s677_s11 }
  0x46   : > { %925 = dma.done.wait (%p1028_p4), %s287_s20, 32  }
  0x47   : > { %927 = vsyncadd (%p1028_p4), %s287_s20, 4294967264 }
  0x48   : > { %929 = dma.done.wait (%p47_p1), [#allocation7], 2048  }
  0x49   : > { %931 = vsyncadd (%p47_p1), [#allocation7], 4294965248  ;;  %v352_v0 = vld [vmem:[#allocation8 + $0x78] sm:$0xff]  ;;  %v351_v1 = vld [vmem:[#allocation8 + $0x70] sm:$0xff]  ;;  %v957_v28 = vmov 0   ;;  %s392_s30 = sld [smem:[#allocation2]]  ;;  %v447_v52 = vlaneseq }
  0x4a   : > { %357 = vmatpush.msra.mxu0 %v352_v0  ;;  %687 = vmatpush.msra.mxu3 %v352_v0  ;;  %v350_v2 = vld [vmem:[#allocation8 + $0x68] sm:$0xff]  ;;  %v349_v3 = vld [vmem:[#allocation8 + $0x60] sm:$0xff]  ;;  %v348_v6 = vld [vmem:[#allocation8 + $0x58] sm:$0xff]  ;;  %vm462_vm2 = vcmask 58368   ;;  %vm497_vm3 = vcmask 64512   ;;  %s683_s13 = sshll.u32 %s1019_s5, 1 }
  0x4b   : > { %v333_v4 = vld [vmem:[%s280_s21] sm:$0xff]  ;;  %v334_v5 = vld [vmem:[%s280_s21 + $0x8] sm:$0xff]  ;;  %772 = vset.pattern.permute.xlu1 %v957_v28  ;;  %773 = vset.pattern.permute.xlu0 %v957_v28  ;;  %v448_v54 = vand.u32 127, %v447_v52  ;;  %s557_s10 = scalar_lea.hbm %s1196_s6, %s683_s13  ;;  %s329_s16 = scalar_lea.vmem [#allocation9], %s677_s11 }
  0x4c   : > { %358 = vmatpush.msra.mxu0 %v351_v1  ;;  %688 = vmatpush.msra.mxu3 %v351_v1  ;;  %v347_v7 = vld [vmem:[#allocation8 + $0x50] sm:$0xff]  ;;  %v346_v8 = vld [vmem:[#allocation8 + $0x48] sm:$0xff]  ;;  %v345_v9 = vld [vmem:[#allocation8 + $0x40] sm:$0xff]  ;;  %s558_s12 = sshll.u32 %s329_s16, 4  ;;  %s560_s17 = sshll.u32 %s557_s10, 4  ;;  %s559_s12 = int_to_ptr.vmem [resolvable:$true] %s558_s12  ;;  %s561_s17 = int_to_ptr.hbm [resolvable:$true] %s560_s17 }
  0x4d   : > { %516 = vmatpush.msra.mxu1 %v333_v4  ;;  %539 = vmatpush.msra.mxu2 %v334_v5  ;;  %v344_v10 = vld [vmem:[#allocation8 + $0x38] sm:$0xff]  ;;  %v343_v11 = vld [vmem:[#allocation8 + $0x30] sm:$0xff]  ;;  %v342_v12 = vld [vmem:[#allocation8 + $0x28] sm:$0xff]  ;;  %s547_s19 = scalar_lea.sflag [#allocation5], %s1123_s15  ;;  %s890_s8 = sshra.s32 %s561_s17, 4  ;;  %s891_s8 = int_to_ptr.hbm [resolvable:$true] %s890_s8 }
  0x4e   : > { %359 = vmatpush.msra.mxu0 %v350_v2  ;;  %689 = vmatpush.msra.mxu3 %v350_v2  ;;  %v341_v13 = vld [vmem:[#allocation8 + $0x20] sm:$0xff]  ;;  %v340_v14 = vld [vmem:[#allocation8 + $0x18] sm:$0xff]  ;;  %v339_v15 = vld [vmem:[#allocation8 + $0x10] sm:$0xff]  ;;  %s892_s21 = scalar_lea.hbm %s891_s8, 2  ;;  %s896_s20 = scalar_lea.hbm %s1196_s6, 4 }
  0x4f   : > { %v338_v16 = vld [vmem:[#allocation8 + $0x8] sm:$0xff]  ;;  %v337_v17 = vld [vmem:[#allocation8] sm:$0xff]  ;;  %v774_v18 = vld [vmem:[%s1193_s3] ss:$0 sm:$0xff]  ;;  %v393_v29 = vstv %s392_s30  ;;  %p893_p1 = scmp.ne.s32.totalorder %s891_s8, %s892_s21  ;;  %p897_p2 = scmp.lt.s32.totalorder %s891_s8, %s1196_s6 }
  0x50   : > { %360 = vmatpush.msra.mxu0 %v349_v3  ;;  %690 = vmatpush.msra.mxu3 %v349_v3  ;;  %v775_v22 = vld [vmem:[%s1194_s4] ss:$0 sm:$0xff]  ;;  %v335_v53 = vld [vmem:[%s1135_s27] sm:$0x1]  ;;  %v336_v58 = vld [vmem:[%s1135_s27 + $0x1] sm:$0x1]  ;;  %p898_p10 = scmp.lt.s32.totalorder %s896_s20, %s892_s21 }
  0x51   : > { %vm396_vm0 = vcmp.eq.f32.partialorder %v335_v53, 0.0  ;;  %vm397_vm1 = vcmp.eq.f32.partialorder %v336_v58, 0.0  ;;  %p894_p4 = pnand %p893_p1, %p1068_p7 }
  0x52   : > { %361 = vmatpush.msra.mxu0 %v348_v6  ;;  %691 = vmatpush.msra.mxu3 %v348_v6  ;;  %p899_p11 = por %p898_p10, %p897_p2 }
  0x53   : > { %p895_p8 = pneg %p894_p4 }
  0x54   : > { %362 = vmatpush.msra.mxu0 %v347_v7  ;;  %692 = vmatpush.msra.mxu3 %v347_v7 }
  0x55   : > { %p900_p9 = pnand %p899_p11, %p895_p8 }
  0x56   : > { %363 = vmatpush.msra.mxu0 %v346_v8  ;;  %693 = vmatpush.msra.mxu3 %v346_v8 }
  0x58   : > { %364 = vmatpush.msra.mxu0 %v345_v9  ;;  %694 = vmatpush.msra.mxu3 %v345_v9 }
  0x5a   : > { %365 = vmatpush.msra.mxu0 %v344_v10  ;;  %695 = vmatpush.msra.mxu3 %v344_v10 }
  0x5c   : > { %366 = vmatpush.msra.mxu0 %v343_v11  ;;  %696 = vmatpush.msra.mxu3 %v343_v11 }
  0x5e   : > { %367 = vmatpush.msra.mxu0 %v342_v12  ;;  %697 = vmatpush.msra.mxu3 %v342_v12 }
  0x60   : > { %368 = vmatpush.msra.mxu0 %v341_v13  ;;  %698 = vmatpush.msra.mxu3 %v341_v13 }
  0x62   : > { %369 = vmatpush.msra.mxu0 %v340_v14  ;;  %699 = vmatpush.msra.mxu3 %v340_v14 }
  0x64   : > { %370 = vmatpush.msra.mxu0 %v339_v15  ;;  %700 = vmatpush.msra.mxu3 %v339_v15 }
  0x66   : > { %371 = vmatpush.msra.mxu0 %v338_v16  ;;  %701 = vmatpush.msra.mxu3 %v338_v16 }
  0x68   : > { %372 = vmatpush.msra.mxu0 %v337_v17  ;;  %702 = vmatpush.msra.mxu3 %v337_v17 }
  0x69   : > { %373 = vmatmul.f32.vlgmr.msra.gmra.mxu0 %v333_v4  ;;  %376 = vmatmul.f32.vlgmr.msra.gmra.mxu3 %v334_v5 }
  0xe6   : > { %v374_v19 = vpop.f32.mrf.mxu0 }
  0xe7   : > { %v375_v20 = vadd.f32 %v774_v18, %v374_v19 }
  0xe9   : > { %776 = vtanh.f32 %v375_v20 }
  0xec   : > { %v377_v21 = vpop.f32.mrf.mxu3 }
  0xed   : > { %v378_v23 = vadd.f32 %v774_v18, %v377_v21 }
  0xef   : > { %v777_v24 = vpop.eup %776  ;;  %778 = vtanh.f32 %v378_v23 }
  0xf0   : > { %v386_v25 = vmul.f32 %v777_v24, %v775_v22 }
  0xf2   : > { %388 = vadd.xlane.f32.xlu0 %v386_v25 }
  0xf5   : > { %v779_v26 = vpop.eup %778 }
  0xf6   : > { %v387_v27 = vmul.f32 %v779_v26, %v775_v22 }
  0xfa   : > { %390 = vadd.xlane.f32.xlu0 %v387_v27 }
 0x165   : > { %v389_v30 = vpop.xlane.xlu0 %388 }
 0x166   : > { %v394_v31 = vadd.f32 %v393_v29, %v389_v30 }
 0x168   : > { %v400_v32 = vperm.slane %v394_v31, 0  ;;  %v401_v33 = vperm.slane %v394_v31, 1  ;;  %v402_v34 = vperm.slane %v394_v31, 2  ;;  %v403_v35 = vperm.slane %v394_v31, 3 }
 0x169   : > { %v404_v36 = vperm.slane %v394_v31, 4  ;;  %v405_v37 = vperm.slane %v394_v31, 5  ;;  %v406_v38 = vperm.slane %v394_v31, 6  ;;  %v407_v39 = vperm.slane %v394_v31, 7 }
 0x16a   : > { %416 = vst [vmem:[#allocation1] ss:$9 sm:$0xff] %v400_v32 }
 0x16b   : > { %418 = vst [vmem:[#allocation1 + $0x1] ss:$9 sm:$0xff] %v401_v33 }
 0x16c   : > { %420 = vst [vmem:[#allocation1 + $0x2] ss:$9 sm:$0xff] %v402_v34 }
 0x16d   : > { %422 = vst [vmem:[#allocation1 + $0x3] ss:$9 sm:$0xff] %v403_v35  ;;  %v391_v40 = vpop.xlane.xlu0 %390 }
 0x16e   : > { %424 = vst [vmem:[#allocation1 + $0x4] ss:$9 sm:$0xff] %v404_v36  ;;  %v395_v41 = vadd.f32 %v393_v29, %v391_v40 }
 0x16f   : > { %426 = vst [vmem:[#allocation1 + $0x5] ss:$9 sm:$0xff] %v405_v37 }
 0x170   : > { %428 = vst [vmem:[#allocation1 + $0x6] ss:$9 sm:$0xff] %v406_v38  ;;  %v408_v42 = vperm.slane %v395_v41, 0  ;;  %v409_v43 = vperm.slane %v395_v41, 1  ;;  %v410_v44 = vperm.slane %v395_v41, 2  ;;  %v411_v45 = vperm.slane %v395_v41, 3 }
 0x171   : > { %430 = vst [vmem:[#allocation1 + $0x7] ss:$9 sm:$0xff] %v407_v39  ;;  %v412_v47 = vperm.slane %v395_v41, 4  ;;  %v413_v48 = vperm.slane %v395_v41, 5  ;;  %v414_v49 = vperm.slane %v395_v41, 6  ;;  %v415_v50 = vperm.slane %v395_v41, 7 }
 0x178   : > { %v431_v46 = vld [vmem:[#allocation1] sm:$0xff] }
 0x179   : > { %442 = vperm.xlu1 %772, %v431_v46   ;;  %432 = vst [vmem:[#allocation1] ss:$9 sm:$0xff] %v408_v42 }
 0x17a   : > { %433 = vst [vmem:[#allocation1 + $0x1] ss:$9 sm:$0xff] %v409_v43 }
 0x17b   : > { %434 = vst [vmem:[#allocation1 + $0x2] ss:$9 sm:$0xff] %v410_v44 }
 0x17c   : > { %435 = vst [vmem:[#allocation1 + $0x3] ss:$9 sm:$0xff] %v411_v45 }
 0x17d   : > { %436 = vst [vmem:[#allocation1 + $0x4] ss:$9 sm:$0xff] %v412_v47 }
 0x17e   : > { %437 = vst [vmem:[#allocation1 + $0x5] ss:$9 sm:$0xff] %v413_v48 }
 0x17f   : > { %438 = vst [vmem:[#allocation1 + $0x6] ss:$9 sm:$0xff] %v414_v49 }
 0x180   : > { %439 = vst [vmem:[#allocation1 + $0x7] ss:$9 sm:$0xff] %v415_v50 }
 0x187   : > { %v440_v51 = vld [vmem:[#allocation1] sm:$0xff] }
 0x188   : > { %445 = vperm.xlu1 %772, %v440_v51  }
 0x1eb   : > { %v443_v55 = vpop.permute.xlu1 %442 }
 0x1ec   : > { %v449_v56 = vperm.slane %v443_v55, %v448_v54 }
 0x1ee   : > { %v453_v57 = vsel %vm396_vm0, -10000.0, %v449_v56 }
 0x1ef   : > { %457 = vst [vmem:[#allocation1] ss:$9 sm:$0xff] %v453_v57 }
 0x1fa   : > { %v446_v59 = vpop.permute.xlu1 %445 }
 0x1fb   : > { %v450_v60 = vperm.slane %v446_v59, %v448_v54 }
 0x1fd   : > { %v454_v61 = vsel %vm397_vm1, -10000.0, %v450_v60 }
 0x1fe   : > { %459 = vst [vmem:[#allocation1 + $0x1] ss:$9 sm:$0xff] %v454_v61 }
 0x205   : > { %v460_v62 = vld [vmem:[#allocation1] sm:$0xff] }
 0x206   : > { %v463_v63 = vsel %vm462_vm2, %v460_v62, -inf }
 0x207   : > { %464 = vmax.xlane.f32.xlu2 %v463_v63 }
 0x27a   : > { %v465_v0 = vpop.xlane.xlu2 %464 }
 0x27b   : > { %v467_v1 = vperm.slane %v465_v0, 0  ;;  %v468_v2 = vperm.slane %v465_v0, 1 }
 0x27d   : > { %v471_v3 = vsub.f32 %v453_v57, %v467_v1  ;;  %v472_v4 = vsub.f32 %v454_v61, %v468_v2 }
 0x27f   : > { %v473_v5 = vmul.f32 1.442695, %v471_v3  ;;  %v475_v6 = vmul.f32 1.442695, %v472_v4 }
 0x281   : > { %780 = vpow2.f32 %v473_v5 }
 0x282   : > { %782 = vpow2.f32 %v475_v6 }
 0x287   : > { %v781_v7 = vpop.eup %780 }
 0x288   : > { %v783_v8 = vpop.eup %782  ;;  %479 = vst [vmem:[#allocation1] ss:$9 sm:$0xff] %v781_v7 }
 0x289   : > { %481 = vst [vmem:[#allocation1 + $0x1] ss:$9 sm:$0xff] %v783_v8 }
 0x290   : > { %v482_v9 = vld [vmem:[#allocation1] sm:$0xff] }
 0x291   : > { %v484_v10 = vsel %vm462_vm2, %v482_v9, 0.0 }
 0x292   : > { %485 = vadd.xlane.f32.xlu2 %v484_v10 }
 0x305   : > { %v486_v11 = vpop.xlane.xlu2 %485 }
 0x306   : > { %784 = vrcp.f32 %v486_v11 }
 0x30c   : > { %v785_v12 = vpop.eup %784 }
 0x30d   : > { %v489_v13 = vperm.slane %v785_v12, 0  ;;  %v490_v14 = vperm.slane %v785_v12, 1 }
 0x30f   : > { %v493_v15 = vmul.f32 %v781_v7, %v489_v13  ;;  %v494_v16 = vmul.f32 %v783_v8, %v490_v14 }
 0x311   : > { %v495_v17 = vmul.f32 %v493_v15, %v335_v53  ;;  %v496_v18 = vmul.f32 %v494_v16, %v336_v58 }
 0x313   : > { %680 = vmatmul.msk.f32.vlgmr.msra.gmra.mxu1 %vm497_vm3, %v495_v17  ;;  %681 = vmatmul.msk.f32.vlgmr.msra.gmra.mxu2 %vm497_vm3, %v496_v18 }
 0x390   : > { %v518_v19 = vpop.f32.mrf.mxu1 }
 0x391   : > { %544 = vst [vmem:[%s329_s16] sm:$0x1] %v518_v19 }
 0x396   : > { %v541_v20 = vpop.f32.mrf.mxu2 }
 0x397   : > { %545 = vst [vmem:[%s329_s16 + $0x1] sm:$0x1] %v541_v20 }
 0x398   : > { %903 = shalt.err (!%p900_p9)
}
 0x399   : > { %s958_s15 = smov 16   ;;  %s959_s28 = smov 1  }
 0x39a   : > { %711 = dma.vmem_to_hbm [thread:$0]  (%p1068_p7), %s559_s12, 32, %s561_s17, %s547_s19, %s958_s15, %s958_s15, %s959_s28  }
 0x39b PF: > { %s575_s2 = sand.u32 1, %s938_s23   ;;  %p1214_p12 = scmp.ge.s32.totalorder %s950_s26, 2 }
 0x39c   : > { %s576_s14 = scalar_lea.sflag [#allocation5], %s575_s2 }
 0x39d   : > { %p725_p13 = pnand %p1214_p12, %p1033_p6 }
 0x39f   : > { %p726_p0 = pneg %p725_p13 }
 0x3a1   : > { %933 = dma.done.wait (%p726_p0), %s576_s14, 32  }
 0x3a2   : > { %935 = vsyncadd (%p726_p0), %s576_s14, 4294967264  ;;  %s1215_s26 = sld [smem:[#allocation15_spill]]  ;;  %s1218_s23 = smov %s942_s24 }
 0x3a3   : > { %s1216_s22 = sld [smem:[#allocation14_spill]] }
 0x3a4   : > { %s1217_s25 = sld [smem:[#allocation16_spill]] }
 0x3a8   : > { %p23_p3 = scmp.ge.s32.totalorder %s1215_s26, 4  }
 0x3a9   : > { %s1219_s24 = smov %s1216_s22 }
 0x3aa   :  { %25 = sbr.rel (!%p23_p3) target bundleno = 10 (0xa), region = 115 }
 0x3af   :  { %582 = vsyncpa [#allocation4], 1 }
 0x3b0   :  { %584 = vsyncpa [#allocation4 + $0x1], 1 }
 0x3b1   :  { %585 = vsyncpa [#allocation7], 1 }
 0x3b2   :  { %587 = vsyncpa [#allocation7 + $0x1], 1 }
 0x3b3   :  { %588 = vsyncpa [#allocation5], 1 }
 0x3b4   :  { %590 = vsyncpa [#allocation5 + $0x1], 1 }

</bundles_post_ra>
